<compile_context>
chip_gen: v6e
topology: v6e:2x2x1
jax: 0.10.0
libtpu: 0.0.40
codegen_flags: <defaults>
</compile_context>

<pallas_src>
from dataclasses import dataclass

import jax
import jax.numpy as jnp
from jax.experimental import pallas as pl
from jax.experimental.pallas import tpu as pltpu


@dataclass
class ModulationOut:
    shift: jax.Array
    scale: jax.Array
    gate: jax.Array

    def modulate(self, x):
        return (1 + self.scale) * x + self.shift


def _modulation_kernel(vec_ref, w_ref, b_ref, out_ref):
    """Fused SiLU + Linear slab.

    vec_ref: (B, D)        -- constant block index, DMA'd once and kept resident
    w_ref:   (D, TN)       -- one streamed weight slab (native dtype, no upcast)
    b_ref:   (1, TN)
    out_ref: (B, TN)
    """
    v = vec_ref[...].astype(jnp.float32)
    sv = v * jax.nn.sigmoid(v)                    # SiLU in f32 (EUP + VPU, tiny)
    y = jnp.dot(sv.astype(w_ref.dtype), w_ref[...],
                preferred_element_type=jnp.float32)
    out_ref[...] = (y + b_ref[...].astype(jnp.float32)).astype(out_ref.dtype)


def _choose_tn(D, MD, w_dtype):
    """Largest multiple-of-128 column tile whose 2x-buffered weight slab fits
    a conservative VMEM budget (safe on v7x's 64 MiB VMEM/TC)."""
    if MD <= 512:
        return MD                                  # single lane-dense slab
    bpe = jnp.dtype(w_dtype).itemsize
    weight_budget = 36 * 1024 * 1024               # bytes for 2x (D, TN) slabs
    tn = weight_budget // (2 * D * bpe)
    tn = max(128, (tn // 128) * 128)
    tn = min(tn, 2048)                             # amortization plateau
    return min(tn, MD)


def modulation_forward(vec, w_t, bias, *, double: bool, tn=None):
    """Pallas-backed equivalent of Modulation.forward.

    vec:  (B, D)
    w_t:  (D, M*D)  -- transposed nn.Linear weight (bf16 recommended)
    bias: (M*D,)
    Returns (ModulationOut, ModulationOut | None), each field (B, 1, D).
    """
    B, D = vec.shape
    mult = 6 if double else 3
    MD = mult * D
    assert w_t.shape == (D, MD)
    assert bias.shape == (MD,)

    if tn is None:
        tn = _choose_tn(D, MD, w_t.dtype)
    grid = (pl.cdiv(MD, tn),)

    bias2d = bias.reshape(1, MD)

    # Explicit VMEM limit sized from the actual (double-buffered) footprint,
    # capped well under v7x's 64 MiB physical VMEM.
    bpe = lambda dt: jnp.dtype(dt).itemsize
    need = (2 * D * tn * bpe(w_t.dtype)        # weight double buffer (dominant)
            + 2 * B * tn * bpe(vec.dtype)      # out double buffer
            + 2 * tn * bpe(bias.dtype)         # bias double buffer
            + 2 * B * D * bpe(vec.dtype))      # vec (resident)
    vmem_limit = int(min(max(need * 5 // 4, 32 * 1024 * 1024), 48 * 1024 * 1024))

    out = pl.pallas_call(
        _modulation_kernel,
        out_shape=jax.ShapeDtypeStruct((B, MD), vec.dtype),
        grid_spec=pltpu.PrefetchScalarGridSpec(
            num_scalar_prefetch=0,
            grid=grid,
            in_specs=[
                pl.BlockSpec((B, D), lambda j: (0, 0)),    # vec: constant block
                pl.BlockSpec((D, tn), lambda j: (0, j)),   # weight slab stream
                pl.BlockSpec((1, tn), lambda j: (0, j)),   # bias slab
            ],
            out_specs=pl.BlockSpec((B, tn), lambda j: (0, j)),
        ),
        compiler_params=pltpu.CompilerParams(
            dimension_semantics=("parallel",),             # shard cols across TCs (v7x)
            vmem_limit_bytes=vmem_limit,
        ),
    )(vec, w_t, bias2d)

    # out[:, None, :] then chunk along last dim into `mult` pieces of size D.
    out = out[:, None, :]                       # (B, 1, M*D)
    chunks = [out[..., i * D:(i + 1) * D] for i in range(mult)]
    first = ModulationOut(*chunks[:3])
    second = ModulationOut(*chunks[3:]) if double else None
    return first, second


def _reference_forward(vec, w_t, bias, *, double: bool):
    """Plain-JAX reference replicating the PyTorch module semantics."""
    sv = vec * jax.nn.sigmoid(vec)
    out = sv @ w_t + bias                       # (B, M*D)
    out = out[:, None, :]
    D = vec.shape[-1]
    mult = 6 if double else 3
    return [out[..., i * D:(i + 1) * D] for i in range(mult)]


if __name__ == "__main__":
    key = jax.random.PRNGKey(0)

    # --- Test 1: toy double=True config, f32 end-to-end, single-slab grid ---
    B, D = 2, 32
    double = True
    mult = 6
    k_vec, k_w, k_b = jax.random.split(key, 3)
    vec = jax.random.normal(k_vec, (B, D), dtype=jnp.float32)
    # PyTorch linear weight is (out, in); we store it transposed as (in, out).
    w_t = jax.random.normal(k_w, (D, mult * D), dtype=jnp.float32) * 0.02
    bias = jax.random.normal(k_b, (mult * D,), dtype=jnp.float32) * 0.02

    mod1, mod2 = modulation_forward(vec, w_t, bias, double=double)
    jax.block_until_ready(mod1.shift)
    jax.block_until_ready(mod2.gate)

    ref = _reference_forward(vec, w_t, bias, double=double)
    got = [mod1.shift, mod1.scale, mod1.gate, mod2.shift, mod2.scale, mod2.gate]
    for g, r in zip(got, ref):
        assert g.shape == (B, 1, D), g.shape
        assert jnp.allclose(g, r, atol=1e-5, rtol=1e-5)

    # ModulationOut.modulate broadcasting over a seq axis.
    x = jax.random.normal(jax.random.PRNGKey(1), (B, 8, D), dtype=jnp.float32)
    y = jax.block_until_ready(mod1.modulate(x))
    assert y.shape == (B, 8, D)

    # --- Test 2: bf16 weights + multi-tile N grid (exercises the streaming path) ---
    B2, D2 = 2, 256
    k2 = jax.random.PRNGKey(2)
    kv2, kw2, kb2 = jax.random.split(k2, 3)
    vec2 = jax.random.normal(kv2, (B2, D2), dtype=jnp.float32)
    w2 = (jax.random.normal(kw2, (D2, 3 * D2), dtype=jnp.float32) * 0.02
          ).astype(jnp.bfloat16)
    b2 = (jax.random.normal(kb2, (3 * D2,), dtype=jnp.float32) * 0.02
          ).astype(jnp.bfloat16)

    m1, m_none = modulation_forward(vec2, w2, b2, double=False, tn=256)  # grid=(3,)
    jax.block_until_ready(m1.gate)
    assert m_none is None
    ref2 = _reference_forward(vec2, w2.astype(jnp.float32),
                              b2.astype(jnp.float32), double=False)
    for g, r in zip([m1.shift, m1.scale, m1.gate], ref2):
        assert g.shape == (B2, 1, D2), g.shape
        assert jnp.allclose(g.astype(jnp.float32), r, atol=1e-2, rtol=1e-2)

    print("KERNEL_OK")
</pallas_src>

<mosaic_0001>
module attributes {stable_mosaic.version = 11 : i64} {
  func.func @_modulation_kernel(%arg0: i32, %arg1: memref<2x32xf32, #tpu.memory_space<vmem>>, %arg2: memref<32x192xf32, #tpu.memory_space<vmem>>, %arg3: memref<1x192xf32, #tpu.memory_space<vmem>>, %arg4: memref<2x192xf32, #tpu.memory_space<vmem>>) attributes {dimension_semantics = [#tpu.dimension_semantics<parallel>], iteration_bounds = array<i64: 1>, scalar_prefetch = 0 : i64, scratch_operands = 0 : i64, tpu.core_type = #tpu.core_type<tc>, window_params = [{pipeline_mode = #tpu.pipeline_mode<synchronous>, transform_indices = @transform_0, window_bounds = array<i64: 2, 32>}, {transform_indices = @transform_1, window_bounds = array<i64: 32, 192>}, {transform_indices = @transform_2, window_bounds = array<i64: 1, 192>}, {transform_indices = @transform_3, window_bounds = array<i64: 2, 192>}]} {
    %c0 = arith.constant 0 : index
    %c0_0 = arith.constant 0 : index
    %0 = vector.load %arg1[%c0, %c0_0] : memref<2x32xf32, #tpu.memory_space<vmem>>, vector<2x32xf32>
    %1 = arith.negf %0 : vector<2x32xf32>
    %2 = math.exp %1 : vector<2x32xf32>
    %cst = arith.constant 1.000000e+00 : f32
    %3 = vector.broadcast %cst : f32 to vector<2x32xf32>
    %4 = arith.addf %3, %2 : vector<2x32xf32>
    %5 = arith.divf %3, %4 : vector<2x32xf32>
    %6 = arith.mulf %0, %5 : vector<2x32xf32>
    %c0_1 = arith.constant 0 : index
    %c0_2 = arith.constant 0 : index
    %7 = vector.load %arg2[%c0_1, %c0_2] : memref<32x192xf32, #tpu.memory_space<vmem>>, vector<32x192xf32>
    %cst_3 = arith.constant dense<0.000000e+00> : vector<2x192xf32>
    %8 = tpu.matmul %6, %7, %cst_3 {dimension_numbers = #tpu.dot_dimension_numbers<[1], [0], [0], [1], [0, 0, 1, 1], [], []>} : vector<2x32xf32>, vector<32x192xf32>, vector<2x192xf32> -> vector<2x192xf32>
    %c0_4 = arith.constant 0 : index
    %c0_5 = arith.constant 0 : index
    %9 = vector.load %arg3[%c0_4, %c0_5] : memref<1x192xf32, #tpu.memory_space<vmem>>, vector<1x192xf32>
    %10 = vector.broadcast %9 : vector<1x192xf32> to vector<2x192xf32>
    %11 = arith.addf %8, %10 : vector<2x192xf32>
    %c0_6 = arith.constant 0 : index
    %c0_7 = arith.constant 0 : index
    %12 = vector.load %arg4[%c0_6, %c0_7] : memref<2x192xf32, #tpu.memory_space<vmem>>, vector<2x192xf32>
    tpu.vector_store %arg4[%c0_6, %c0_7], %11 {strides = array<i32>} : memref<2x192xf32, #tpu.memory_space<vmem>>, vector<2x192xf32>,
    return
  }
  func.func @transform_0(%arg0: i32) -> (i32, i32) {
    %c0_i32 = arith.constant 0 : i32
    %c0_i32_0 = arith.constant 0 : i32
    %c0_i32_1 = arith.constant 0 : i32
    return %c0_i32, %c0_i32_0 : i32, i32
  }
  func.func @transform_1(%arg0: i32) -> (i32, i32) {
    %c0_i32 = arith.constant 0 : i32
    %c0_i32_0 = arith.constant 0 : i32
    return %c0_i32, %arg0 : i32, i32
  }
  func.func @transform_2(%arg0: i32) -> (i32, i32) {
    %c0_i32 = arith.constant 0 : i32
    %c0_i32_0 = arith.constant 0 : i32
    return %c0_i32, %arg0 : i32, i32
  }
  func.func @transform_3(%arg0: i32) -> (i32, i32) {
    %c0_i32 = arith.constant 0 : i32
    %c0_i32_0 = arith.constant 0 : i32
    return %c0_i32, %arg0 : i32, i32
  }
}

</mosaic_0001>

<bundles_post_ra>
// kernel: tpu_custom_call.1
= control target key start
LH: loop header
LB: loop body
LE: loop exit
PB: predicated region body
PF: predicated region fallthrough
CT: control target
= control target key end

     0   :  { %8 = vsyncpa [#allocation3], 0  ;;  %s293_s0 = inlined_call_operand.hbm [shape: f32[2,32], index: 0, kind: input, shape index: {}]   ;;  %s294_s1 = inlined_call_operand.hbm [shape: f32[32,192], index: 1, kind: input, shape index: {}]   ;;  %s295_s2 = inlined_call_operand.vmem [shape: f32[1,192], index: 2, kind: input, shape index: {}]   ;;  %s296_s3 = inlined_call_operand.hbm [shape: f32[2,192], index: 3, kind: output, shape index: {}]  }
   0x1   :  { %9 = vsyncpa [#allocation6], 0 }
   0x2   :  { %10 = vsyncpa [#allocation4], 0  ;;  %s254_s12 = smov [#allocation2]   ;;  %s255_s14 = smov [#allocation5]  }
   0x3   :  { %s17_s13 = sshll.u32 %s254_s12, 4  ;;  %s26_s15 = sshll.u32 %s255_s14, 4  ;;  %s18_s13 = int_to_ptr.vmem [resolvable:$true] %s17_s13  ;;  %s27_s15 = int_to_ptr.vmem [resolvable:$true] %s26_s15 }
   0x4   :  { %s196_s16 = scalar_lea.vmem %s18_s13, 32  ;;  %p201_p1 = scmp.lt.s32.totalorder %s18_s13, %s18_s13 }
   0x5   :  { %p197_p0 = scmp.ne.s32.totalorder %s18_s13, %s196_s16  ;;  %p202_p2 = scmp.lt.s32.totalorder %s196_s16, %s196_s16 }
   0x7   :  { %p203_p3 = por %p202_p2, %p201_p1 }
   0x9   :  { %p204_p4 = pnand %p203_p3, %p197_p0 }
   0xb   :  { %207 = shalt.err (!%p204_p4)
}
   0xc   :  { %20 = dma.hbm_to_vmem [thread:$0]  %s293_s0, 32, %s18_s13, [#allocation3]  }
   0xd   :  { %s216_s19 = scalar_lea.vmem %s27_s15, 1024  ;;  %p221_p6 = scmp.lt.s32.totalorder %s27_s15, %s27_s15 }
   0xe   :  { %p217_p5 = scmp.ne.s32.totalorder %s27_s15, %s216_s19  ;;  %p222_p7 = scmp.lt.s32.totalorder %s216_s19, %s216_s19 }
  0x10   :  { %p223_p8 = por %p222_p7, %p221_p6 }
  0x12   :  { %p224_p9 = pnand %p223_p8, %p217_p5 }
  0x14   :  { %227 = shalt.err (!%p224_p9)
}
  0x15   :  { %s256_s20 = smov 256   ;;  %s257_s21 = smov 16  }
  0x16   :  { %32 = dma.hbm_to_vmem [thread:$0]  %s294_s1, 1024, %s27_s15, [#allocation6], %s256_s20, %s256_s20, %s257_s21  }
  0x17   :  { %248 = dma.done.wait [#allocation3], 32  }
  0x18   :  { %249 = vsyncadd [#allocation3], 4294967264 }
  0x19   :  { %250 = dma.done.wait [#allocation6], 1024  }
  0x1a   :  { %251 = vsyncadd [#allocation6], 4294966272  ;;  %v258_v0 = vmov 0.0   ;;  %v56_v1 = vld [vmem:[#allocation5 + $0x38] sm:$0xff]  ;;  %v55_v2 = vld [vmem:[#allocation5 + $0x30] sm:$0xff]  ;;  %vm69_vm0 = vcmask 261120   ;;  %v59_v15 = vlaneseq }
  0x1b   :  { %137 = vmatprep.mubr.f32.mxu0 %v258_v0  ;;  %v54_v3 = vld [vmem:[#allocation5 + $0x28] sm:$0xff]  ;;  %97 = vmatprep.subr.mxu0 %v56_v1  ;;  %v53_v4 = vld [vmem:[#allocation5 + $0x20] sm:$0xff]  ;;  %v52_v5 = vld [vmem:[#allocation5 + $0x18] sm:$0xff]  ;;  %v259_v17 = vmov 1983009808   ;;  %vm155_vm1 = vcmask 1041408  }
  0x1c   :  { %98 = vmatpush1.msra.mxu0 %v55_v2  ;;  %v41_v6 = vld [vmem:[#allocation2] sm:$0x3]  ;;  %v51_v7 = vld [vmem:[#allocation5 + $0x10] sm:$0xff]  ;;  %v50_v9 = vld [vmem:[#allocation5 + $0x8] sm:$0xff]  ;;  %v60_v16 = vshrl.u32 %v59_v15, 7  ;;  %v148_v18 = vunpack.c.l.s4 %v259_v17  ;;  %vm156_vm2 = vcmask 519170  }
  0x1d   :  { %99 = vmatprep.subr.mxu0 %v54_v3  ;;  %v175_v8 = vmul.f32 -1.442695, %v41_v6  ;;  %v49_v10 = vld [vmem:[#allocation5] sm:$0xff]  ;;  %v57_v21 = vld [vmem:[%s295_s2] sm:$0x3]  ;;  %s260_s24 = smov [#allocation7]   ;;  %vm157_vm3 = vmor %vm156_vm2, %vm155_vm1 }
  0x1e   :  { %100 = vmatpush1.msra.mxu0 %v53_v4  ;;  %v61_v19 = vsub.s32 0, %v60_v16  ;;  %v65_v20 = vsub.s32 1, %v60_v16  ;;  %v149_v22 = vunpack.c.0.s8 %v148_v18  ;;  %s165_s25 = sshll.u32 %s260_s24, 4  ;;  %s166_s25 = int_to_ptr.vmem [resolvable:$true] %s165_s25 }
  0x1f   :  { %101 = vmatprep.subr.mxu0 %v52_v5  ;;  %184 = vpow2.f32 %v175_v8  ;;  %s228_s26 = scalar_lea.vmem %s166_s25, 64  ;;  %p233_p11 = scmp.lt.s32.totalorder %s166_s25, %s166_s25 }
  0x20   :  { %102 = vmatpush1.msra.mxu0 %v51_v7  ;;  %v62_v23 = vrot.slane %v57_v21, %v61_v19  ;;  %v66_v24 = vrot.slane %v57_v21, %v65_v20  ;;  %v152_v27 = vsub.s32 %v149_v22, %v60_v16  ;;  %p229_p10 = scmp.ne.s32.totalorder %s166_s25, %s228_s26  ;;  %p234_p12 = scmp.lt.s32.totalorder %s228_s26, %s228_s26 }
  0x21   :  { %103 = vmatprep.subr.mxu0 %v50_v9 }
  0x22   :  { %104 = vmatpush1.msra.mxu0 %v49_v10  ;;  %p235_p13 = por %p234_p12, %p233_p11 }
  0x24   :  { %p236_p0 = pnand %p235_p13, %p229_p10 }
  0x2c   :  { %v185_v11 = vpop.eup %184 }
  0x2d   :  { %v45_v12 = vadd.f32 1.0, %v185_v11 }
  0x2f   :  { %186 = vrcp.f32 %v45_v12 }
  0x3c   :  { %v187_v13 = vpop.eup %186 }
  0x3d   :  { %v48_v14 = vmul.f32 %v187_v13, %v41_v6 }
  0x3f   :  { %176 = vmatmul.mubr.msk.f32.vlgmr.msra.gmra.mxu0 %vm69_vm0, %v48_v14 }
  0xff   :  { %v139_v25 = vpop.f32.mrf.mxu0 }
 0x100   :  { %v140_v28 = vadd.f32 %v139_v25, %v62_v23 }
 0x101   :  { %v141_v26 = vpop.f32.mrf.mxu0 }
 0x102   :  { %v142_v29 = vadd.f32 %v141_v26, %v66_v24 }
 0x104   :  { %v146_v30 = vcombine.low %v140_v28, %v142_v29 }
 0x106   :  { %v153_v31 = vrot.slane %v146_v30, %v152_v27 }
 0x108   :  { %158 = vst.msk [vmem:[#allocation7] sm:$0xf] %vm157_vm3, %v153_v31 }
 0x109   :  { %239 = shalt.err (!%p236_p0)
}
 0x10a   :  { %168 = dma.vmem_to_hbm [thread:$0]  %s166_s25, 64, %s296_s3, [#allocation4]  }
 0x10b   :  { %252 = dma.done.wait [#allocation4], 64  }
 0x10c   :  { %253 = vsyncadd [#allocation4], 4294967232 }
 0x10d   :  { %172 = vsyncpa [#allocation3], 1 }
 0x10e   :  { %173 = vsyncpa [#allocation6], 1 }
 0x10f   :  { %174 = vsyncpa [#allocation4], 1 }

</bundles_post_ra>
